<compile_context>
chip_gen: v6e
topology: v6e:2x2x1
jax: 0.10.0
libtpu: 0.0.40
codegen_flags: <defaults>
</compile_context>

<pallas_src>
import functools

import jax
import jax.numpy as jnp
from jax.experimental import pallas as pl
from jax.experimental.pallas import tpu as pltpu


def _round_up(x, m):
    return ((x + m - 1) // m) * m


def attention2_kernel(x_ref, w_ref, b_ref, o_ref, *, bb, s, a_col):
    # x_ref: (BB, S, D)  w_ref: (D, W_total)  b_ref: (1, W_total)  o_ref: (BB, a_col)
    d = x_ref.shape[-1]
    w_total = w_ref.shape[-1]

    # Fused QKV projection: one (BB*S, D) @ (D, W_total) MXU push + one bias add.
    # No dtype upcast of x -- bf16 inputs feed the MXU directly, accumulation is f32.
    x2 = x_ref[...].reshape(bb * s, d)
    qkv = jnp.dot(x2, w_ref[...], preferred_element_type=jnp.float32) + b_ref[...]
    qkv = qkv.reshape(bb, s, w_total)

    q = qkv[:, :, 0 * a_col:1 * a_col]                            # (BB, S, a_col)
    k = qkv[:, :, 1 * a_col:2 * a_col]
    v = qkv[:, :, 2 * a_col:3 * a_col]

    # scores[b] = Q[b] @ K[b]^T, contracting last dims (transpose stays in the MXU
    # feed path -- no explicit XLU vxpose).
    scores = jnp.einsum("bqa,bka->bqk", q, k,
                        preferred_element_type=jnp.float32)       # (BB, S, S)

    # Numerically-stable softmax over the key axis (matches F.softmax(dim=-1)).
    # EXACT division: the approx EUP reciprocal previously broke numerical parity.
    m = jnp.max(scores, axis=-1, keepdims=True)
    p = jnp.exp(scores - m)                                       # unnormalized probs
    inv = 1.0 / jnp.sum(p, axis=-1, keepdims=True)                # (BB, S, 1), >= is exact

    # sum over the query axis of softmax(S) @ V
    #   == (sum_q inv_q * P_q) @ V       (exact identity)
    # Both contractions run on the MXU instead of an S^2 VPU normalize + XLU reduces.
    w_col = jnp.einsum("bqx,bqk->bxk", inv, p,
                       preferred_element_type=jnp.float32)        # (BB, 1, S)
    out = jnp.einsum("bxk,bka->bxa", w_col, v,
                     preferred_element_type=jnp.float32)          # (BB, 1, a_col)

    o_ref[...] = out[:, 0, :].astype(o_ref.dtype)


def _per_step_vmem_bytes(bb, s, d, w_total, a_col, itemsize):
    """Approximate per-grid-step VMEM footprint (excluding the grid-invariant weights)."""
    return (2 * bb * s * d * itemsize        # x block (double-buffered)
            + bb * s * w_total * 4           # fused qkv (f32)
            + 2 * bb * s * s * 4             # scores + exp(scores)
            + 2 * bb * a_col * itemsize)     # output block (double-buffered)


def _pick_bb(b, s, d, w_total, a_col, itemsize, vmem_budget_bytes=16 << 20):
    """Batch elements per grid step.

    Prefer a SINGLE grid step (BB == B): on 1-TC chips (v5e/v6e) any grid split is a
    serial loop with fixed per-step overhead, and on v7x megacore sharding only pays once
    each half is multi-microseconds of MXU work.  Only split when the per-step footprint
    would not fit the VMEM budget; then prefer BB a multiple of 8 so the (BB, a_col)
    output block stays sublane-dense (no masked vst.msk partial stores).
    """
    if _per_step_vmem_bytes(b, s, d, w_total, a_col, itemsize) <= vmem_budget_bytes:
        return b
    divisors = [q for q in range(1, b + 1) if b % q == 0]
    cand = [q for q in divisors
            if _per_step_vmem_bytes(q, s, d, w_total, a_col, itemsize) <= vmem_budget_bytes]
    cand = cand or [1]
    mult8 = [q for q in cand if q % 8 == 0]
    return max(mult8) if mult8 else max(cand)


def attention2(x, w1, b1, w2, b2, w3, b3):
    B, S, D = x.shape
    A = w1.shape[1]
    b1, b2, b3 = (t.reshape(1, -1) for t in (b1, b2, b3))

    # ---- Fused, lane-padded QKV weights --------------------------------------------
    # Padding columns are zero so padded outputs are exactly zero and sliced off after
    # the kernel (exact, not an approximation).
    if 3 * A <= 128:
        # Compact scheme: pad the concatenated 3*A once up to 128 (avoids 3x the MXU
        # output columns / 4x the weight DMA that per-projection padding costs).
        a_col = A
        w_cat = jnp.concatenate([w1, w2, w3], axis=1)
        b_cat = jnp.concatenate([b1, b2, b3], axis=1)
    else:
        # Aligned scheme: pad each projection to a multiple of 128 so the q/k/v slices
        # in the kernel are tile-aligned (free).
        a_col = _round_up(A, 128)
        pad = lambda t: jnp.pad(t, ((0, 0), (0, a_col - A)))
        w_cat = jnp.concatenate([pad(w1), pad(w2), pad(w3)], axis=1)
        b_cat = jnp.concatenate([pad(b1), pad(b2), pad(b3)], axis=1)

    w_total = _round_up(3 * a_col, 128)
    w_qkv = jnp.pad(w_cat, ((0, 0), (0, w_total - w_cat.shape[1])))
    b_qkv = jnp.pad(b_cat, ((0, 0), (0, w_total - b_cat.shape[1])))

    # ---- Grid / tiling policy --------------------------------------------------------
    x_item = x.dtype.itemsize
    BB = _pick_bb(B, S, D, w_total, a_col, x_item)
    grid_b = B // BB

    per_step = _per_step_vmem_bytes(BB, S, D, w_total, a_col, x_item)
    weight_bytes = (w_qkv.size * w_qkv.dtype.itemsize + b_qkv.size * b_qkv.dtype.itemsize)
    # Explicit VMEM limit with headroom; capped so it is valid on v7x's 64 MiB as well.
    vmem_limit = int(min(max(2 * (per_step + weight_bytes) + (4 << 20), 8 << 20), 32 << 20))

    # dtype-aware cost estimate so XLA schedules surrounding ops sensibly.
    flops = int(2 * B * S * D * w_total        # projection
                + 2 * B * S * S * a_col        # scores
                + 2 * B * S * S                # inv-weighted column sum
                + 2 * B * S * a_col)           # weighted sum with V
    cost = pl.CostEstimate(
        flops=flops,
        transcendentals=int(B * S * S),
        bytes_accessed=int(x.size * x_item + weight_bytes + B * a_col * x_item),
    )

    # Grid-invariant operands: single-buffer them when the grid actually has >1 step so
    # multi-step configs don't burn 2x the weight tile of VMEM (matters on v7x's 64 MiB).
    wb_kwargs = {}
    if grid_b > 1:
        wb_kwargs = dict(pipeline_mode=pl.Buffered(1))

    kernel = functools.partial(attention2_kernel, bb=BB, s=S, a_col=a_col)

    out_padded = pl.pallas_call(
        kernel,
        out_shape=jax.ShapeDtypeStruct((B, a_col), x.dtype),
        grid_spec=pltpu.PrefetchScalarGridSpec(
            num_scalar_prefetch=0,
            grid=(grid_b,),
            in_specs=[
                pl.BlockSpec((BB, S, D), lambda b: (b, 0, 0)),
                pl.BlockSpec((D, w_total), lambda b: (0, 0), **wb_kwargs),
                pl.BlockSpec((1, w_total), lambda b: (0, 0), **wb_kwargs),
            ],
            out_specs=pl.BlockSpec((BB, a_col), lambda b: (b, 0)),
        ),
        compiler_params=pltpu.CompilerParams(
            dimension_semantics=("parallel",),
            vmem_limit_bytes=vmem_limit,
        ),
        cost_estimate=cost,
    )(x, w_qkv, b_qkv)

    return out_padded[:, :A]


def reference(x, w1, b1, w2, b2, w3, b3):
    xf = x.astype(jnp.float32)
    q = xf @ w1 + b1.reshape(1, -1)
    k = xf @ w2 + b2.reshape(1, -1)
    v = xf @ w3 + b3.reshape(1, -1)
    s = jnp.einsum("bqa,bka->bqk", q, k)
    p = jax.nn.softmax(s, axis=-1)
    ctx = jnp.einsum("bqk,bka->bqa", p, v)
    return jnp.sum(ctx, axis=1)


if __name__ == "__main__":
    B, S, D_IN, A_DIM = 2, 8, 32, 32

    key = jax.random.PRNGKey(0)
    kx, k1, k2, k3, kb1, kb2, kb3 = jax.random.split(key, 7)

    x = jax.random.normal(kx, (B, S, D_IN), dtype=jnp.float32)

    # nn.Linear(input_dim, attention_dim) parameters, stored transposed as (D_in, A);
    # biases kept 2D (1, A) for a TPU-friendly layout.
    w1 = jax.random.normal(k1, (D_IN, A_DIM), dtype=jnp.float32) * 0.1
    w2 = jax.random.normal(k2, (D_IN, A_DIM), dtype=jnp.float32) * 0.1
    w3 = jax.random.normal(k3, (D_IN, A_DIM), dtype=jnp.float32) * 0.1
    b1 = jax.random.normal(kb1, (1, A_DIM), dtype=jnp.float32) * 0.1
    b2 = jax.random.normal(kb2, (1, A_DIM), dtype=jnp.float32) * 0.1
    b3 = jax.random.normal(kb3, (1, A_DIM), dtype=jnp.float32) * 0.1

    out = jax.block_until_ready(attention2(x, w1, b1, w2, b2, w3, b3))
    ref = jax.block_until_ready(reference(x, w1, b1, w2, b2, w3, b3))

    assert out.shape == (B, A_DIM)
    max_err = float(jnp.max(jnp.abs(out - ref)))
    assert jnp.allclose(out, ref, atol=1e-4, rtol=1e-4), f"max abs err = {max_err}"

    print("KERNEL_OK")
</pallas_src>

<mosaic_0001>
module attributes {stable_mosaic.version = 11 : i64} {
  func.func @attention2_kernel(%arg0: i32, %arg1: memref<2x8x32xf32, #tpu.memory_space<vmem>>, %arg2: memref<32x128xf32, #tpu.memory_space<vmem>>, %arg3: memref<1x128xf32, #tpu.memory_space<vmem>>, %arg4: memref<2x32xf32, #tpu.memory_space<vmem>>) attributes {dimension_semantics = [#tpu.dimension_semantics<parallel>], iteration_bounds = array<i64: 1>, scalar_prefetch = 0 : i64, scratch_operands = 0 : i64, tpu.core_type = #tpu.core_type<tc>, window_params = [{transform_indices = @transform_0, window_bounds = array<i64: 2, 8, 32>}, {pipeline_mode = #tpu.pipeline_mode<synchronous>, transform_indices = @transform_1, window_bounds = array<i64: 32, 128>}, {pipeline_mode = #tpu.pipeline_mode<synchronous>, transform_indices = @transform_2, window_bounds = array<i64: 1, 128>}, {transform_indices = @transform_3, window_bounds = array<i64: 2, 32>}]} {
    %c0 = arith.constant 0 : index
    %c0_0 = arith.constant 0 : index
    %c0_1 = arith.constant 0 : index
    %0 = vector.load %arg1[%c0, %c0_0, %c0_1] : memref<2x8x32xf32, #tpu.memory_space<vmem>>, vector<2x8x32xf32>
    %1 = vector.shape_cast %0 : vector<2x8x32xf32> to vector<16x32xf32>
    %c0_2 = arith.constant 0 : index
    %c0_3 = arith.constant 0 : index
    %2 = vector.load %arg2[%c0_2, %c0_3] : memref<32x128xf32, #tpu.memory_space<vmem>>, vector<32x128xf32>
    %cst = arith.constant dense<0.000000e+00> : vector<16x128xf32>
    %3 = tpu.matmul %1, %2, %cst {dimension_numbers = #tpu.dot_dimension_numbers<[1], [0], [0], [1], [0, 0, 1, 1], [], []>} : vector<16x32xf32>, vector<32x128xf32>, vector<16x128xf32> -> vector<16x128xf32>
    %c0_4 = arith.constant 0 : index
    %c0_5 = arith.constant 0 : index
    %4 = vector.load %arg3[%c0_4, %c0_5] : memref<1x128xf32, #tpu.memory_space<vmem>>, vector<1x128xf32>
    %5 = vector.broadcast %4 : vector<1x128xf32> to vector<16x128xf32>
    %6 = arith.addf %3, %5 : vector<16x128xf32>
    %7 = vector.shape_cast %6 : vector<16x128xf32> to vector<2x8x128xf32>
    %8 = vector.extract_strided_slice %7 {offsets = [0, 0, 0], sizes = [2, 8, 32], strides = [1, 1, 1]} : vector<2x8x128xf32> to vector<2x8x32xf32>
    %9 = vector.extract_strided_slice %7 {offsets = [0, 0, 32], sizes = [2, 8, 32], strides = [1, 1, 1]} : vector<2x8x128xf32> to vector<2x8x32xf32>
    %10 = vector.extract_strided_slice %7 {offsets = [0, 0, 64], sizes = [2, 8, 32], strides = [1, 1, 1]} : vector<2x8x128xf32> to vector<2x8x32xf32>
    "tpu.trace_start"() <{level = 10 : i32, message = "bqa,bka->bqk"}> : () -> ()
    %cst_6 = arith.constant dense<0.000000e+00> : vector<2x8x8xf32>
    %11 = tpu.matmul %8, %9, %cst_6 {dimension_numbers = #tpu.dot_dimension_numbers<[2], [2], [1], [1], [0, 0, 0, 1, 1, 1], [0], [0]>} : vector<2x8x32xf32>, vector<2x8x32xf32>, vector<2x8x8xf32> -> vector<2x8x8xf32>
    "tpu.trace_stop"() : () -> ()
    %cst_7 = arith.constant dense<0xFF800000> : vector<2x8xf32>
    %12 = vector.multi_reduction <maximumf>, %11, %cst_7 [2] : vector<2x8x8xf32> to vector<2x8xf32>
    %13 = vector.shape_cast %12 : vector<2x8xf32> to vector<2x8x1xf32>
    %14 = vector.broadcast %13 : vector<2x8x1xf32> to vector<2x8x8xf32>
    %15 = arith.subf %11, %14 : vector<2x8x8xf32>
    %16 = math.exp %15 : vector<2x8x8xf32>
    %cst_8 = arith.constant dense<0.000000e+00> : vector<2x8xf32>
    %17 = vector.multi_reduction <add>, %16, %cst_8 [2] : vector<2x8x8xf32> to vector<2x8xf32>
    %18 = vector.shape_cast %17 : vector<2x8xf32> to vector<2x8x1xf32>
    %cst_9 = arith.constant 1.000000e+00 : f32
    %19 = vector.broadcast %cst_9 : f32 to vector<2x8x1xf32>
    %20 = arith.divf %19, %18 : vector<2x8x1xf32>
    "tpu.trace_start"() <{level = 10 : i32, message = "bqx,bqk->bxk"}> : () -> ()
    %cst_10 = arith.constant dense<0.000000e+00> : vector<2x1x8xf32>
    %21 = tpu.matmul %20, %16, %cst_10 {dimension_numbers = #tpu.dot_dimension_numbers<[1], [1], [2], [2], [0, 0, 0, 2, 1, 2], [0], [0]>} : vector<2x8x1xf32>, vector<2x8x8xf32>, vector<2x1x8xf32> -> vector<2x1x8xf32>
    "tpu.trace_stop"() : () -> ()
    "tpu.trace_start"() <{level = 10 : i32, message = "bxk,bka->bxa"}> : () -> ()
    %cst_11 = arith.constant dense<0.000000e+00> : vector<2x1x32xf32>
    %22 = tpu.matmul %21, %10, %cst_11 {dimension_numbers = #tpu.dot_dimension_numbers<[2], [1], [1], [2], [0, 0, 0, 1, 1, 2], [0], [0]>} : vector<2x1x8xf32>, vector<2x8x32xf32>, vector<2x1x32xf32> -> vector<2x1x32xf32>
    "tpu.trace_stop"() : () -> ()
    %23 = vector.shape_cast %22 : vector<2x1x32xf32> to vector<2x32xf32>
    %c0_12 = arith.constant 0 : index
    %c0_13 = arith.constant 0 : index
    %24 = vector.load %arg4[%c0_12, %c0_13] : memref<2x32xf32, #tpu.memory_space<vmem>>, vector<2x32xf32>
    tpu.vector_store %arg4[%c0_12, %c0_13], %23 {strides = array<i32>} : memref<2x32xf32, #tpu.memory_space<vmem>>, vector<2x32xf32>,
    return
  }
  func.func @transform_0(%arg0: i32) -> (i32, i32, i32) {
    %c0_i32 = arith.constant 0 : i32
    %c0_i32_0 = arith.constant 0 : i32
    %c0_i32_1 = arith.constant 0 : i32
    return %arg0, %c0_i32, %c0_i32_0 : i32, i32, i32
  }
  func.func @transform_1(%arg0: i32) -> (i32, i32) {
    %c0_i32 = arith.constant 0 : i32
    %c0_i32_0 = arith.constant 0 : i32
    %c0_i32_1 = arith.constant 0 : i32
    return %c0_i32, %c0_i32_0 : i32, i32
  }
  func.func @transform_2(%arg0: i32) -> (i32, i32) {
    %c0_i32 = arith.constant 0 : i32
    %c0_i32_0 = arith.constant 0 : i32
    %c0_i32_1 = arith.constant 0 : i32
    return %c0_i32, %c0_i32_0 : i32, i32
  }
  func.func @transform_3(%arg0: i32) -> (i32, i32) {
    %c0_i32 = arith.constant 0 : i32
    %c0_i32_0 = arith.constant 0 : i32
    return %arg0, %c0_i32 : i32, i32
  }
}

</mosaic_0001>

<bundles_post_ra>
// kernel: tpu_custom_call.1
= control target key start
LH: loop header
LB: loop body
LE: loop exit
PB: predicated region body
PF: predicated region fallthrough
CT: control target
= control target key end

     0   :  { %8 = vsyncpa [#allocation3], 0  ;;  %s927_s0 = inlined_call_operand.hbm [shape: f32[2,8,32], index: 0, kind: input, shape index: {}]   ;;  %s928_s1 = inlined_call_operand.hbm [shape: f32[32,128], index: 1, kind: input, shape index: {}]   ;;  %s929_s2 = inlined_call_operand.vmem [shape: f32[1,128], index: 2, kind: input, shape index: {}]   ;;  %s930_s3 = inlined_call_operand.hbm [shape: f32[2,32], index: 3, kind: output, shape index: {}]  }
   0x1   :  { %9 = vsyncpa [#allocation6], 0 }
   0x2   :  { %10 = vsyncpa [#allocation4], 0  ;;  %s854_s12 = smov [#allocation2]  }
   0x3   :  { %s16_s13 = sshll.u32 %s854_s12, 4  ;;  %s17_s13 = int_to_ptr.vmem [resolvable:$true] %s16_s13 }
   0x4   :  { %s796_s14 = scalar_lea.vmem %s17_s13, 256  ;;  %p801_p1 = scmp.lt.s32.totalorder %s17_s13, %s17_s13 }
   0x5   :  { %p797_p0 = scmp.ne.s32.totalorder %s17_s13, %s796_s14  ;;  %p802_p2 = scmp.lt.s32.totalorder %s796_s14, %s796_s14 }
   0x7   :  { %p803_p3 = por %p802_p2, %p801_p1 }
   0x9   :  { %p804_p4 = pnand %p803_p3, %p797_p0 }
   0xb   :  { %807 = shalt.err (!%p804_p4)
}
   0xc   :  { %s855_s15 = smov 128   ;;  %s856_s16 = smov 8  }
   0xd   :  { %22 = dma.hbm_to_vmem [thread:$0]  %s927_s0, 256, %s17_s13, [#allocation3], %s855_s15, %s855_s15, %s856_s16  }
   0xe   :  { %s857_s19 = smov [#allocation5]  }
   0xf   :  { %s28_s20 = sshll.u32 %s857_s19, 4  ;;  %s29_s20 = int_to_ptr.vmem [resolvable:$true] %s28_s20 }
  0x10   :  { %s816_s21 = scalar_lea.vmem %s29_s20, 512  ;;  %p821_p6 = scmp.lt.s32.totalorder %s29_s20, %s29_s20 }
  0x11   :  { %p817_p5 = scmp.ne.s32.totalorder %s29_s20, %s816_s21  ;;  %p822_p7 = scmp.lt.s32.totalorder %s816_s21, %s816_s21 }
  0x13   :  { %p823_p8 = por %p822_p7, %p821_p6 }
  0x15   :  { %p824_p9 = pnand %p823_p8, %p817_p5 }
  0x17   :  { %827 = shalt.err (!%p824_p9)
}
  0x18   :  { %34 = dma.hbm_to_vmem [thread:$0]  %s928_s1, 512, %s29_s20, [#allocation6], %s855_s15, %s855_s15, %s856_s16  }
  0x19   :  { %848 = dma.done.wait [#allocation3], 256  }
  0x1a   :  { %849 = vsyncadd [#allocation3], 4294967040 }
  0x1b   :  { %850 = dma.done.wait [#allocation6], 512  }
  0x1c   :  { %851 = vsyncadd [#allocation6], 4294966784  ;;  %vm56_vm0 = vcmask 261120   ;;  %v48_v0 = vld [vmem:[#allocation5 + $0x18] sm:$0xff]  ;;  %v47_v1 = vld [vmem:[#allocation5 + $0x10] sm:$0xff]  ;;  %v858_v6 = vmov 0.0  }
  0x1d   :  { %730 = vmatprep.subr.mxu0 %v48_v0  ;;  %v43_v2 = vld [vmem:[#allocation2] sm:$0xff]  ;;  %v46_v3 = vld [vmem:[#allocation5 + $0x8] sm:$0xff]  ;;  %v45_v4 = vld [vmem:[#allocation5] sm:$0xff]  ;;  %741 = vmatprep.subr.mxu1 %v858_v6  ;;  %vm859_vm1 = vmmov 0   ;;  %s860_s24 = smov 96   ;;  %vm292_vm2 = vcmask 64512  }
  0x1e   :  { %731 = vmatpush3.msra.mxu0 %v48_v0  ;;  %738 = vmatprep.mubr.msk.f32.mxu0 %vm56_vm0, %v43_v2  ;;  %v44_v5 = vld [vmem:[#allocation2 + $0x8] sm:$0xff]  ;;  %v701_v8 = vld [vmem:[%s929_s2] ss:$0 sm:$0xff]  ;;  %s861_s2 = smov 64   ;;  %s862_s25 = smov [#allocation7]   ;;  %vm680_vm3 = vcmask 1041409  }
  0x1f   :  { %732 = vmatprep.subr.mxu0 %v47_v1  ;;  %743 = vmatprep.mubr.msk.f32.mxu1 %vm859_vm1, %v858_v6  ;;  %s691_s26 = sshll.u32 %s862_s25, 4  ;;  %vm683_vm4 = vcmask 254976   ;;  %s692_s26 = int_to_ptr.vmem [resolvable:$true] %s691_s26 }
  0x20   :  { %733 = vmatpush3.msra.mxu0 %v47_v1  ;;  %s828_s27 = scalar_lea.vmem %s692_s26, 32  ;;  %p833_p11 = scmp.lt.s32.totalorder %s692_s26, %s692_s26 }
  0x21   :  { %734 = vmatprep.subr.mxu0 %v46_v3  ;;  %p829_p10 = scmp.ne.s32.totalorder %s692_s26, %s828_s27  ;;  %p834_p12 = scmp.lt.s32.totalorder %s828_s27, %s828_s27 }
  0x22   :  { %735 = vmatpush3.msra.mxu0 %v46_v3 }
  0x23   :  { %736 = vmatprep.subr.mxu0 %v45_v4  ;;  %p835_p13 = por %p834_p12, %p833_p11 }
  0x24   :  { %737 = vmatpush3.msra.mxu0 %v45_v4 }
  0x25   :  { %739 = vmatmul.mubr.msk.f32.vlgmr.msra.gmra.mxu0 %vm56_vm0, %v44_v5  ;;  %751 = vmatprep.subr.mxu0 %v858_v6  ;;  %p836_p0 = pnand %p835_p13, %p829_p10 }
  0x26   :  { %753 = vmatprep.mubr.msk.f32.mxu0 %vm859_vm1, %v858_v6 }
  0xe5   :  { %v740_v7 = vpop.f32.mrf.mxu0 }
  0xe6   :  { %v135_v11 = vadd.f32 %v740_v7, %v701_v8 }
  0xe7   :  { %v129_v9 = vpop.f32.mrf.mxu0 }
  0xe8   :  { %v130_v10 = vadd.f32 %v701_v8, %v129_v9 }
  0xea   :  { %139 = vrot.lane.b32.xlu0 %v130_v10, %s860_s24 }
  0xee   :  { %216 = vrot.lane.b32.xlu0 %v135_v11, %s860_s24 }
 0x15c   :  { %v140_v12 = vpop.permute.xlu0 %139 }
 0x15d   :  { %742 = vmatpush3.xpose.msk.msra.mxu1 %vm56_vm0, %v140_v12 }
 0x15e   :  { %746 = vmatprep.subr.mxu1 %v858_v6 }
 0x160   :  { %744 = vmatmul.mubr.msk.f32.vlgmr.msra.gmra.mxu1 %vm56_vm0, %v130_v10  ;;  %v217_v13 = vpop.permute.xlu0 %216 }
 0x161   :  { %747 = vmatpush3.xpose.msk.msra.mxu1 %vm56_vm0, %v217_v13  ;;  %748 = vmatprep.mubr.msk.f32.mxu1 %vm859_vm1, %v858_v6 }
 0x162   :  { %756 = vmatprep.subr.mxu1 %v858_v6 }
 0x164   :  { %749 = vmatmul.mubr.msk.f32.vlgmr.msra.gmra.mxu1 %vm56_vm0, %v135_v11 }
 0x165   :  { %758 = vmatprep.mubr.msk.f32.mxu1 %vm859_vm1, %v858_v6 }
 0x220   :  { %v211_v14 = vpop.f32.mrf.mxu1 }
 0x221   :  { %v293_v19 = vsel %vm292_vm2, %v211_v14, -inf }
 0x222   :  { %v745_v15 = vpop.f32.mrf.mxu1 }
 0x224   :  { %v288_v16 = vpop.f32.mrf.mxu1 }
 0x225   :  { %v296_v17 = vsel %vm292_vm2, %v288_v16, -inf }
 0x226   :  { %297 = vmax.xlane.f32.xlu1 %v296_v17  ;;  %v750_v18 = vpop.f32.mrf.mxu1 }
 0x22a   :  { %294 = vmax.xlane.f32.xlu1 %v293_v19 }
 0x2af   :  { %v298_v20 = vpop.xlane.xlu1 %297 }
 0x2b0   :  { %v300_v21 = vsub.f32 %v288_v16, %v298_v20 }
 0x2b2   :  { %v303_v22 = vmul.f32 1.442695, %v300_v21 }
 0x2b3   :  { %v295_v23 = vpop.xlane.xlu1 %294 }
 0x2b4   :  { %780 = vpow2.f32 %v303_v22  ;;  %v299_v24 = vsub.f32 %v211_v14, %v295_v23 }
 0x2b6   :  { %v301_v25 = vmul.f32 1.442695, %v299_v24 }
 0x2b8   :  { %782 = vpow2.f32 %v301_v25 }
 0x2c1   :  { %v781_v26 = vpop.eup %780 }
 0x2c2   :  { %757 = vmatpush3.msra.mxu1 %v781_v26  ;;  %v308_v27 = vsel %vm292_vm2, %v781_v26, 0.0 }
 0x2c3   :  { %309 = vadd.xlane.f32.xlu0 %v308_v27  ;;  %766 = vmatprep.subr.mxu1 %v858_v6 }
 0x2c5   :  { %v783_v28 = vpop.eup %782 }
 0x2c6   :  { %752 = vmatpush3.msra.mxu0 %v783_v28  ;;  %v305_v29 = vsel %vm292_vm2, %v783_v28, 0.0 }
 0x2c7   :  { %306 = vadd.xlane.f32.xlu1 %v305_v29  ;;  %761 = vmatprep.subr.mxu0 %v858_v6 }
 0x34c   :  { %v310_v30 = vpop.xlane.xlu0 %309 }
 0x34d   :  { %784 = vrcp.f32 %v310_v30 }
 0x350   :  { %v307_v31 = vpop.xlane.xlu1 %306 }
 0x351   :  { %786 = vrcp.f32 %v307_v31 }
 0x35a   :  { %v785_v32 = vpop.eup %784 }
 0x35b   :  { %420 = vxpose.xlu1.b32.start.end [1/1] (short) (narrow) %v785_v32, 8 }
 0x35e   :  { %v787_v33 = vpop.eup %786 }
 0x35f   :  { %315 = vxpose.xlu0.b32.start.end [1/1] (short) (narrow) %v787_v33, 8 }
 0x379   :  { %601 = vrot.lane.b32.xlu1 %v135_v11, %s861_s2 }
 0x388   :  { %525 = vrot.lane.b32.xlu0 %v130_v10, %s861_s2 }
 0x3d7   :  { %v436_v34 = vpop.trf.xlu1 }
 0x3d8   :  { %759 = vmatmul.mubr.msk.f32.vlgmr.msra.gmra.mxu1 %vm292_vm2, %v436_v34 }
 0x3d9   :  { %768 = vmatprep.mubr.msk.f32.mxu1 %vm859_vm1, %v858_v6 }
 0x3db   :  { %v331_v35 = vpop.trf.xlu0 }
 0x3dc   :  { %754 = vmatmul.mubr.msk.f32.vlgmr.msra.gmra.mxu0 %vm292_vm2, %v331_v35 }
 0x3dd   :  { %763 = vmatprep.mubr.msk.f32.mxu0 %vm859_vm1, %v858_v6 }
 0x3eb   :  { %v602_v36 = vpop.permute.xlu1 %601 }
 0x3ec   :  { %767 = vmatpush3.msra.mxu1 %v602_v36 }
 0x3fa   :  { %v526_v37 = vpop.permute.xlu0 %525 }
 0x3fb   :  { %762 = vmatpush3.msra.mxu0 %v526_v37 }
 0x498   :  { %v521_v38 = vpop.f32.mrf.mxu1 }
 0x499   :  { %769 = vmatmul.mubr.msk.f32.vlgmr.msra.gmra.mxu1 %vm292_vm2, %v521_v38 }
 0x49a   :  { %v760_v39 = vpop.f32.mrf.mxu1 }
 0x49c   :  { %v416_v40 = vpop.f32.mrf.mxu0 }
 0x49d   :  { %764 = vmatmul.mubr.msk.f32.vlgmr.msra.gmra.mxu0 %vm292_vm2, %v416_v40 }
 0x49e   :  { %v755_v41 = vpop.f32.mrf.mxu0 }
 0x559   :  { %v673_v42 = vpop.f32.mrf.mxu1 }
 0x55a   :  { %v679_v43 = vrot.slane %v673_v42, 7 }
 0x55b   :  { %v770_v44 = vpop.f32.mrf.mxu1 }
 0x55d   :  { %v597_v45 = vpop.f32.mrf.mxu0 }
 0x55e   :  { %v681_v46 = vsel %vm680_vm3, %v679_v43, %v597_v45 }
 0x55f   :  { %v765_v47 = vpop.f32.mrf.mxu0  ;;  %684 = vst.msk [vmem:[#allocation7] sm:$0x3] %vm683_vm4, %v681_v46 }
 0x560   :  { %839 = shalt.err (!%p836_p0)
}
 0x561   :  { %694 = dma.vmem_to_hbm [thread:$0]  %s692_s26, 32, %s930_s3, [#allocation4]  }
 0x562   :  { %852 = dma.done.wait [#allocation4], 32  }
 0x563   :  { %853 = vsyncadd [#allocation4], 4294967264 }
 0x564   :  { %698 = vsyncpa [#allocation3], 1 }
 0x565   :  { %699 = vsyncpa [#allocation6], 1 }
 0x566   :  { %700 = vsyncpa [#allocation4], 1 }

</bundles_post_ra>
